<compile_context>
chip_gen: v7x
topology: tpu7x:2x2x1
jax: 0.10.0
libtpu: 0.0.40
codegen_flags: <defaults>
</compile_context>

<pallas_src>
import functools

import jax
import jax.numpy as jnp
from jax.experimental import pallas as pl
from jax.experimental.pallas import tpu as pltpu


def _round_up(x, m):
    return ((x + m - 1) // m) * m


def _pick_tile(hw, c, desired):
    """Largest lane tile (multiple of 128) keeping kernel-1 VMEM use ~<= 12 MiB.

    Budget covers double-buffered logits/target/outputs plus ~4 logits-sized
    f32 temps, so the default scoped VMEM limit is enough on v5e/v6e/v7x.
    """
    per_lane_bytes = 4 * (7 * c + 10)
    budget = 12 * 1024 * 1024
    t = min(desired, budget // per_lane_bytes)
    t = max(128, (t // 128) * 128)
    t = min(t, _round_up(hw, 128))
    return t


def _pixel_ce_kernel(logits_ref, target_ref, prob_ref, ce_ref, *, ignore_index):
    """Per-pixel softmax CE + true-class prob.

    Invalid (target == ignore_index) and pad pixels are encoded as prob = 2.0
    (so downstream `prob <= thr` never keeps them) and ce = 0.0.
    """
    x = logits_ref[...].astype(jnp.float32)              # (C, T)
    t = target_ref[...]                                  # (1, T) int32
    valid = t != ignore_index
    t0 = jnp.where(valid, t, 0)

    m = jnp.max(x, axis=0, keepdims=True)                # (1, T)
    lse = m + jnp.log(jnp.sum(jnp.exp(x - m), axis=0, keepdims=True))

    cls = jax.lax.broadcasted_iota(jnp.int32, x.shape, 0)          # (C, T)
    true_logit = jnp.sum(jnp.where(cls == t0, x, 0.0), axis=0, keepdims=True)

    ce = lse - true_logit                                # per-pixel CE loss
    true_prob = jnp.exp(-ce)                             # softmax prob of true class

    prob_ref[...] = jnp.where(valid, true_prob, 2.0)
    ce_ref[...] = jnp.where(valid, ce, 0.0)


def _ohem_reduce_kernel(thr_ref, prob_ref, ce_ref, sum_ref, cnt_ref, vsum, vcnt):
    """Masked reduction: sum(ce * kept), count(kept), kept = prob <= thr."""
    i = pl.program_id(0)

    @pl.when(i == 0)
    def _():
        vsum[...] = jnp.zeros_like(vsum)
        vcnt[...] = jnp.zeros_like(vcnt)

    thr = thr_ref[0]                                     # scalar in SMEM
    kept = prob_ref[...] <= thr                          # (1, T) bool
    vsum[...] += jnp.where(kept, ce_ref[...], 0.0)
    vcnt[...] += kept.astype(jnp.float32)

    # Cross-lane reduce + scalar store only once, at the end of the grid.
    @pl.when(i == pl.num_programs(0) - 1)
    def _():
        sum_ref[...] = jnp.sum(vsum[...]).reshape(1, 1)
        cnt_ref[...] = jnp.sum(vcnt[...]).reshape(1, 1)


def ohem_cross_entropy(pred, target, *, ignore_index=255, thresh=0.7,
                       min_kept=100000, tile_n=None):
    """Pallas TPU implementation of OhemCrossEntropy.forward(pred, target)."""
    b, c, h, w = pred.shape
    hw = h * w
    n_real = b * hw

    tile = _pick_tile(hw, c, 4096 if tile_n is None else tile_n)
    hw_pad = _round_up(hw, tile)
    tiles_per_b = hw_pad // tile
    n_pad = b * hw_pad

    logits = pred.reshape(b, c, hw)                      # free reshape, no transpose
    tgt = target.reshape(b, 1, hw).astype(jnp.int32)
    if hw_pad != hw:
        # Only when H*W is not a multiple of the tile (rare for segmentation
        # shapes); costs one extra copy of the logits.
        logits = jnp.pad(logits, ((0, 0), (0, 0), (0, hw_pad - hw)))
        tgt = jnp.pad(tgt, ((0, 0), (0, 0), (0, hw_pad - hw)),
                      constant_values=ignore_index)

    kernel1 = functools.partial(_pixel_ce_kernel, ignore_index=ignore_index)
    prob, ce = pl.pallas_call(
        kernel1,
        out_shape=(
            jax.ShapeDtypeStruct((1, n_pad), jnp.float32),
            jax.ShapeDtypeStruct((1, n_pad), jnp.float32),
        ),
        grid_spec=pltpu.PrefetchScalarGridSpec(
            num_scalar_prefetch=0,
            grid=(b, tiles_per_b),
            in_specs=[
                pl.BlockSpec((None, c, tile), lambda bi, j: (bi, 0, j)),
                pl.BlockSpec((None, 1, tile), lambda bi, j: (bi, 0, j)),
            ],
            out_specs=[
                pl.BlockSpec((1, tile), lambda bi, j: (0, bi * tiles_per_b + j)),
                pl.BlockSpec((1, tile), lambda bi, j: (0, bi * tiles_per_b + j)),
            ],
        ),
        compiler_params=pltpu.CompilerParams(
            dimension_semantics=("parallel", "parallel")),
    )(logits, tgt)

    prob_flat = prob[0]                                  # (n_pad,)
    # Exact integer count of valid pixels (pads/invalid are encoded as 2.0).
    num_valid = jnp.sum((prob_flat < 1.5).astype(jnp.int32))

    # OHEM threshold: k-th smallest of mask_prob (invalid pixels count as 1.0,
    # exactly like PyTorch's masked_fill_(~valid, 1); extra pad 1.0s cannot
    # change the k-th smallest since 1.0 is the maximum value).
    # TODO(synk): k-th-smallest selection has no clean Pallas TPU primitive;
    # done with jax.lax.top_k in XLA glue (much cheaper than a full sort).
    if min_kept > 0:
        clamped = jnp.minimum(prob_flat, 1.0)
        k = min(n_real, min_kept)
        neg_top, _ = jax.lax.top_k(-clamped, k)
        kth_smallest = -neg_top[k - 1]
        threshold = jnp.maximum(jnp.float32(thresh), kth_smallest)
        # PyTorch: `if min_kept > num_valid: pass  elif num_valid > 0: <ohem>`
        do_ohem = jnp.logical_and(num_valid >= min_kept, num_valid > 0)
        # 1.5 keeps every valid pixel (valid prob <= 1.0 < 1.5 < invalid 2.0).
        thr_eff = jnp.where(do_ohem, threshold, jnp.float32(1.5))
    else:
        thr_eff = jnp.float32(1.5)

    thr_arr = thr_eff.reshape(1).astype(jnp.float32)

    sum_loss, cnt = pl.pallas_call(
        _ohem_reduce_kernel,
        out_shape=(
            jax.ShapeDtypeStruct((1, 1), jnp.float32),
            jax.ShapeDtypeStruct((1, 1), jnp.float32),
        ),
        grid_spec=pltpu.PrefetchScalarGridSpec(
            num_scalar_prefetch=0,
            grid=(n_pad // tile,),
            in_specs=[
                pl.BlockSpec(memory_space=pltpu.MemorySpace.SMEM),
                pl.BlockSpec((1, tile), lambda i: (0, i)),
                pl.BlockSpec((1, tile), lambda i: (0, i)),
            ],
            out_specs=[
                pl.BlockSpec((1, 1), lambda i: (0, 0)),
                pl.BlockSpec((1, 1), lambda i: (0, 0)),
            ],
            scratch_shapes=[pltpu.VMEM((1, tile), jnp.float32),
                            pltpu.VMEM((1, tile), jnp.float32)],
        ),
        compiler_params=pltpu.CompilerParams(dimension_semantics=("arbitrary",)),
    )(thr_arr, prob, ce)

    # nn.CrossEntropyLoss(ignore_index=...) default reduction: mean over kept
    # pixels (NaN for zero kept pixels, same as PyTorch).
    return sum_loss[0, 0] / cnt[0, 0]


def ohem_cross_entropy_ref(pred, target, *, ignore_index=255, thresh=0.7,
                           min_kept=100000):
    """Pure-JAX reference matching the PyTorch module semantics."""
    b, c, h, w = pred.shape
    n = b * h * w
    t = target.reshape(-1).astype(jnp.int32)
    valid = t != ignore_index
    t0 = jnp.where(valid, t, 0)
    num_valid = jnp.sum(valid)

    logits = jnp.transpose(pred, (1, 0, 2, 3)).reshape(c, n).astype(jnp.float32)
    logp = jax.nn.log_softmax(logits, axis=0)
    prob = jnp.exp(logp)
    idx = jnp.arange(n)
    mask_prob = jnp.where(valid, prob[t0, idx], 1.0)

    if min_kept > 0:
        sorted_p = jnp.sort(mask_prob)
        cand = sorted_p[min(n, min_kept) - 1]
        threshold = jnp.maximum(jnp.float32(thresh), cand)
    else:
        threshold = jnp.float32(thresh)

    do_ohem = jnp.logical_and(num_valid >= min_kept, num_valid > 0)
    kept = jnp.where(do_ohem, valid & (mask_prob <= threshold), valid)
    keptf = kept.astype(jnp.float32)
    ce = -logp[t0, idx]
    return jnp.sum(ce * keptf) / jnp.sum(keptf)


if __name__ == "__main__":
    key = jax.random.PRNGKey(0)
    k_pred, k_tgt, k_ign = jax.random.split(key, 3)

    B, C, H, W = 2, 4, 16, 16
    ignore_index = 255
    thresh = 0.7
    min_kept = 200  # small enough vs N=512 so the OHEM branch is exercised

    pred = jax.random.normal(k_pred, (B, C, H, W), dtype=jnp.float32)
    target = jax.random.randint(k_tgt, (B, H, W), 0, C, dtype=jnp.int32)
    # Sprinkle in some ignore_index pixels.
    ign_mask = jax.random.uniform(k_ign, (B, H, W)) < 0.1
    target = jnp.where(ign_mask, ignore_index, target)

    loss = ohem_cross_entropy(pred, target, ignore_index=ignore_index,
                              thresh=thresh, min_kept=min_kept)
    loss = jax.block_until_ready(loss)

    loss_ref = ohem_cross_entropy_ref(pred, target, ignore_index=ignore_index,
                                      thresh=thresh, min_kept=min_kept)
    loss_ref = jax.block_until_ready(loss_ref)

    assert jnp.isfinite(loss), "loss is not finite"
    assert jnp.allclose(loss, loss_ref, rtol=1e-5, atol=1e-5), (loss, loss_ref)

    print("KERNEL_OK")
</pallas_src>

<mosaic_0001>
module attributes {stable_mosaic.version = 11 : i64} {
  func.func @_pixel_ce_kernel(%arg0: i32, %arg1: i32, %arg2: memref<1x4x256xf32, #tpu.memory_space<vmem>>, %arg3: memref<1x1x256xi32, #tpu.memory_space<vmem>>, %arg4: memref<1x256xf32, #tpu.memory_space<vmem>>, %arg5: memref<1x256xf32, #tpu.memory_space<vmem>>) attributes {dimension_semantics = [#tpu.dimension_semantics<parallel>, #tpu.dimension_semantics<parallel>], iteration_bounds = array<i64: 2, 1>, scalar_prefetch = 0 : i64, scratch_operands = 0 : i64, tpu.core_type = #tpu.core_type<tc>, window_params = [{transform_indices = @transform_0, window_bounds = array<i64: 1, 4, 256>}, {transform_indices = @transform_1, window_bounds = array<i64: 1, 1, 256>}, {transform_indices = @transform_2, window_bounds = array<i64: 1, 256>}, {transform_indices = @transform_3, window_bounds = array<i64: 1, 256>}]} {
    %c0 = arith.constant 0 : index
    %c0_0 = arith.constant 0 : index
    %c0_1 = arith.constant 0 : index
    %0 = vector.load %arg2[%c0, %c0_0, %c0_1] : memref<1x4x256xf32, #tpu.memory_space<vmem>>, vector<1x4x256xf32>
    %1 = vector.shape_cast %0 : vector<1x4x256xf32> to vector<4x256xf32>
    %c0_2 = arith.constant 0 : index
    %c0_3 = arith.constant 0 : index
    %c0_4 = arith.constant 0 : index
    %2 = vector.load %arg3[%c0_2, %c0_3, %c0_4] : memref<1x1x256xi32, #tpu.memory_space<vmem>>, vector<1x1x256xi32>
    %3 = vector.shape_cast %2 : vector<1x1x256xi32> to vector<1x256xi32>
    %c255_i32 = arith.constant 255 : i32
    %4 = vector.broadcast %c255_i32 : i32 to vector<1x256xi32>
    %5 = arith.cmpi ne, %3, %4 : vector<1x256xi32>
    %c0_i32 = arith.constant 0 : i32
    %6 = vector.broadcast %c0_i32 : i32 to vector<1x256xi32>
    %7 = arith.select %5, %3, %6 : vector<1x256xi1>, vector<1x256xi32>
    %cst = arith.constant dense<0xFF800000> : vector<256xf32>
    %8 = vector.multi_reduction <maximumf>, %1, %cst [0] : vector<4x256xf32> to vector<256xf32>
    %9 = vector.shape_cast %8 : vector<256xf32> to vector<1x256xf32>
    %10 = vector.broadcast %9 : vector<1x256xf32> to vector<4x256xf32>
    %11 = arith.subf %1, %10 : vector<4x256xf32>
    %12 = math.exp %11 : vector<4x256xf32>
    %cst_5 = arith.constant dense<0.000000e+00> : vector<256xf32>
    %13 = vector.multi_reduction <add>, %12, %cst_5 [0] : vector<4x256xf32> to vector<256xf32>
    %14 = vector.shape_cast %13 : vector<256xf32> to vector<1x256xf32>
    %15 = math.log %14 : vector<1x256xf32>
    %16 = arith.addf %9, %15 : vector<1x256xf32>
    %17 = tpu.iota {dimensions = array<i32: 0>} : vector<4x256xi32>
    %18 = vector.broadcast %7 : vector<1x256xi32> to vector<4x256xi32>
    %19 = arith.cmpi eq, %17, %18 : vector<4x256xi32>
    %cst_6 = arith.constant 0.000000e+00 : f32
    %20 = vector.broadcast %cst_6 : f32 to vector<4x256xf32>
    %21 = arith.select %19, %1, %20 : vector<4x256xi1>, vector<4x256xf32>
    %cst_7 = arith.constant dense<0.000000e+00> : vector<256xf32>
    %22 = vector.multi_reduction <add>, %21, %cst_7 [0] : vector<4x256xf32> to vector<256xf32>
    %23 = vector.shape_cast %22 : vector<256xf32> to vector<1x256xf32>
    %24 = arith.subf %16, %23 : vector<1x256xf32>
    %cst_8 = arith.constant 0.000000e+00 : f32
    %25 = vector.broadcast %cst_8 : f32 to vector<1x256xf32>
    %26 = arith.subf %25, %24 : vector<1x256xf32>
    %27 = math.exp %26 : vector<1x256xf32>
    %cst_9 = arith.constant 2.000000e+00 : f32
    %28 = vector.broadcast %cst_9 : f32 to vector<1x256xf32>
    %29 = arith.select %5, %27, %28 : vector<1x256xi1>, vector<1x256xf32>
    %c0_10 = arith.constant 0 : index
    %c0_11 = arith.constant 0 : index
    %30 = vector.load %arg4[%c0_10, %c0_11] : memref<1x256xf32, #tpu.memory_space<vmem>>, vector<1x256xf32>
    tpu.vector_store %arg4[%c0_10, %c0_11], %29 {strides = array<i32>} : memref<1x256xf32, #tpu.memory_space<vmem>>, vector<1x256xf32>,
    %cst_12 = arith.constant 0.000000e+00 : f32
    %31 = vector.broadcast %cst_12 : f32 to vector<1x256xf32>
    %32 = arith.select %5, %24, %31 : vector<1x256xi1>, vector<1x256xf32>
    %c0_13 = arith.constant 0 : index
    %c0_14 = arith.constant 0 : index
    %33 = vector.load %arg5[%c0_13, %c0_14] : memref<1x256xf32, #tpu.memory_space<vmem>>, vector<1x256xf32>
    tpu.vector_store %arg5[%c0_13, %c0_14], %32 {strides = array<i32>} : memref<1x256xf32, #tpu.memory_space<vmem>>, vector<1x256xf32>,
    return
  }
  func.func @transform_0(%arg0: i32, %arg1: i32) -> (i32, i32, i32) {
    %c0_i32 = arith.constant 0 : i32
    %c0_i32_0 = arith.constant 0 : i32
    return %arg0, %c0_i32, %arg1 : i32, i32, i32
  }
  func.func @transform_1(%arg0: i32, %arg1: i32) -> (i32, i32, i32) {
    %c0_i32 = arith.constant 0 : i32
    %c0_i32_0 = arith.constant 0 : i32
    return %arg0, %c0_i32, %arg1 : i32, i32, i32
  }
  func.func @transform_2(%arg0: i32, %arg1: i32) -> (i32, i32) {
    %c1_i32 = arith.constant 1 : i32
    %0 = arith.muli %arg0, %c1_i32 : i32
    %1 = arith.addi %0, %arg1 : i32
    %c0_i32 = arith.constant 0 : i32
    %c0_i32_0 = arith.constant 0 : i32
    return %c0_i32, %1 : i32, i32
  }
  func.func @transform_3(%arg0: i32, %arg1: i32) -> (i32, i32) {
    %c1_i32 = arith.constant 1 : i32
    %0 = arith.muli %arg0, %c1_i32 : i32
    %1 = arith.addi %0, %arg1 : i32
    %c0_i32 = arith.constant 0 : i32
    %c0_i32_0 = arith.constant 0 : i32
    return %c0_i32, %1 : i32, i32
  }
}

</mosaic_0001>

<bundles_post_ra>
// kernel: tpu_custom_call.1
= control target key start
LH: loop header
LB: loop body
LE: loop exit
PB: predicated region body
PF: predicated region fallthrough
CT: control target
= control target key end

     0   :  { %9 = vsyncpa [#allocation3], 0  ;;  %s1170_s0 = inlined_call_operand.hbm [shape: f32[2,4,256], index: 0, kind: input, shape index: {}]   ;;  %s1171_s1 = inlined_call_operand.hbm [shape: s32[2,1,256], index: 1, kind: input, shape index: {}]   ;;  %s1172_s2 = inlined_call_operand.hbm [shape: f32[1,512], index: 2, kind: output, shape index: {0}]   ;;  %s1173_s3 = inlined_call_operand.hbm [shape: f32[1,512], index: 3, kind: output, shape index: {1}]  }
   0x1   :  { %11 = vsyncpa [#allocation3 + $0x1], 0 }
   0x2   :  { %12 = vsyncpa [#allocation6], 0 }
   0x3   :  { %14 = vsyncpa [#allocation6 + $0x1], 0 }
   0x4   :  { %15 = vsyncpa [#allocation4], 0 }
   0x5   :  { %17 = vsyncpa [#allocation4 + $0x1], 0 }
   0x6   :  { %18 = vsyncpa [#allocation9], 0 }
   0x7   :  { %20 = vsyncpa [#allocation9 + $0x1], 0  ;;  %s891_s12 = smov 0   ;;  %s893_s13 = smov 0  }
   0x8   :  { %s895_s14 = smov 0   ;;  %s897_s15 = smov 0  }
   0x9   :  { %s899_s16 = smov 0   ;;  %s901_s17 = smov 0  }
   0xa LB: > { %s575_s18 = sadd.s32 4294967295, %s864_s17   ;;  %s576_s19 = sadd.s32 4294967294, %s864_s17   ;;  %s864_s17 = sphi %s901_s17, %s26_s17   ;;  %s860_s16 = sphi %s899_s16, %s1195_s16   ;;  %s856_s15 = sphi %s897_s15, %s1194_s15   ;;  %s852_s14 = sphi %s895_s14, %s1193_s14   ;;  %s848_s13 = sphi %s893_s13, %s1192_s13   ;;  %s844_s12 = sphi %s891_s12, %s1191_s12  }
   0xb   : > { %s38_s20 = sadd.s32 1, %s860_s16  ;;  %s47_s21 = sadd.s32 1, %s852_s14 }
   0xc   : > { %p40_p0 = scmp.ge.s32.totalorder %s38_s20, 2  ;;  %p54_p1 = scmp.ne.s32.totalorder %s852_s14, %s848_s13 }
   0xd   : > { %p55_p2 = scmp.eq.s32.totalorder %s864_s17, 0  ;;  %p60_p3 = scmp.ne.s32.totalorder %s848_s13, %s844_s12 }
   0xe   : > { %s1197_s20 = smov (%p40_p0, %s38_s20), 0  ;;  %p61_p5 = scmp.eq.s32.totalorder %s575_s18, 0 }
   0xf   : > { %p932_p4 = por %p55_p2, %p54_p1  ;;  %s42_s23 = ssub.s32 %s860_s16, %s1197_s20 }
  0x10   : > { %p114_p6 = scmp.eq.s32.totalorder %s575_s18, 1  ;;  %p45_p7 = scmp.eq.s32.totalorder %s42_s23, 0 }
  0x11   : > { %p938_p8 = por %p61_p5, %p60_p3  ;;  %p120_p10 = scmp.eq.s32.totalorder %s576_s19, 1 }
  0x12   : > { %p942_p9 = por %p114_p6, %p54_p1  ;;  %p624_p13 = scmp.lt.s32.totalorder %s864_s17, 2 }
  0x13   : > { %s1177_s24 = scalar_select %p938_p8, 1, 0 }
  0x14   : > { %s1178_s25 = scalar_select %p942_p9, 1, 0 }
  0x15   : > { %s947_s26 = scalar_select %p45_p7, %s852_s14, %s47_s21  }
  0x16   : > { %p949_p11 = por %p120_p10, %p60_p3  ;;  %s956_s28 = sand.u32 1, %s852_s14  }
  0x17   : > { %s579_s29 = sshll.u32 %s956_s28, 3  ;;  %s598_s30 = sshll.u32 %s860_s16, 7 }
  0x18   : > { %s1179_s27 = scalar_select %p949_p11, 1, 0 }
  0x19   : > { %s963_s6 = scalar_lea.hbm %s1170_s0, %s598_s30  ;;  %s172_s7 = scalar_lea.vmem [#allocation2], %s579_s29 }
  0x1a   : > { %s182_s8 = sshll.u32 %s172_s7, 4  ;;  %p969_p0 = pnand %p624_p13, %p932_p4  ;;  %s965_s8 = int_to_ptr.vmem [resolvable:$true] %s182_s8 }
  0x1b   : > { %s169_s10 = scalar_lea.sflag [#allocation3], %s956_s28  ;;  %s686_s11 = scalar_lea.hbm %s963_s6, 128 }
  0x1c   : > { %p687_p3 = scmp.ne.s32.totalorder %s963_s6, %s686_s11  ;;  %p688_p5 = pneg %p969_p0 }
  0x1d   : > { %s691_s21 = scalar_lea.hbm %s1170_s0, 256  ;;  %p692_p4 = scmp.lt.u32.totalorder %s963_s6, %s1170_s0 }
  0x1e   : > { %p689_p6 = pnand %p688_p5, %p687_p3  ;;  %p693_p10 = scmp.lt.u32.totalorder %s691_s21, %s686_s11 }
  0x1f   : > { %p695_p12 = scmp.lt.u32.totalorder %s686_s11, %s963_s6 }
  0x20   : > { %p690_p7 = pneg %p689_p6  ;;  %p694_p13 = por %p693_p10, %p692_p4 }
  0x22   : > { %p696_p1 = por %p695_p12, %p694_p13 }
  0x24   : > { %p697_p2 = pnand %p696_p1, %p690_p7 }
  0x26   : > { %700 = shalt.err (!%p697_p2)
}
  0x27   : > { %s701_s29 = scalar_lea.vmem %s965_s8, 128  ;;  %s866_s30 = smov [#allocation2]  }
  0x28   : > { %p702_p3 = scmp.ne.s32.totalorder %s965_s8, %s701_s29  ;;  %s706_s4 = sshll.u32 %s866_s30, 4  ;;  %s707_s4 = int_to_ptr.vmem [resolvable:$false] %s706_s4 }
  0x29   : > { %s708_s5 = scalar_lea.vmem %s707_s4, 256  ;;  %p709_p9 = scmp.lt.s32.totalorder %s965_s8, %s707_s4 }
  0x2a   : > { %p704_p6 = pnand %p702_p3, %p688_p5  ;;  %p710_p4 = scmp.lt.s32.totalorder %s708_s5, %s701_s29 }
  0x2c   : > { %p705_p11 = pneg %p704_p6  ;;  %p711_p10 = por %p710_p4, %p709_p9 }
  0x2e   : > { %p712_p12 = pnand %p711_p10, %p705_p11 }
  0x30   : > { %715 = shalt.err (!%p712_p12)
}
  0x31   : > { %613 = dma.hbm_to_vmem [thread:$0]  (!%p969_p0), %s963_s6, 128, %s965_s8, %s169_s10  }
  0x32   : > { %p1181_p1 = scmp.lt.s32.totalorder %s864_s17, 3  ;;  %p1182_p2 = scmp.ge.s32.totalorder %s864_s17, 1 }
  0x33   : > { %s582_s11 = sshll.u32 %s956_s28, 1  ;;  %s599_s18 = sshll.u32 %s860_s16, 5 }
  0x34   : > { %p1005_p7 = pnand %p1182_p2, %p1181_p1  ;;  %s1014_s22 = scalar_lea.hbm %s1171_s1, %s599_s18 }
  0x35   : > { %s193_s23 = scalar_lea.vmem [#allocation5], %s582_s11  ;;  %s190_s6 = scalar_lea.sflag [#allocation6], %s956_s28 }
  0x36   : > { %s1183_s7 = scalar_select %p1005_p7, 1, 0 }
  0x37   : > { %s203_s29 = sshll.u32 %s193_s23, 4  ;;  %s716_s8 = scalar_lea.hbm %s1014_s22, 32  ;;  %s204_s29 = int_to_ptr.vmem [resolvable:$true] %s203_s29 }
  0x38   : > { %p717_p9 = scmp.ne.s32.totalorder %s1014_s22, %s716_s8  ;;  %s721_s4 = scalar_lea.hbm %s1171_s1, 64 }
  0x39   : > { %p722_p3 = scmp.lt.u32.totalorder %s1014_s22, %s1171_s1  ;;  %p723_p6 = scmp.lt.u32.totalorder %s721_s4, %s716_s8 }
  0x3a   : > { %p719_p11 = pnand %p717_p9, %p688_p5  ;;  %p725_p10 = scmp.lt.u32.totalorder %s716_s8, %s1014_s22 }
  0x3b   : > { %p724_p4 = por %p723_p6, %p722_p3 }
  0x3c   : > { %p720_p13 = pneg %p719_p11 }
  0x3d   : > { %p726_p12 = por %p725_p10, %p724_p4 }
  0x3f   : > { %p727_p1 = pnand %p726_p12, %p720_p13 }
  0x41   : > { %730 = shalt.err (!%p727_p1)
}
  0x42   : > { %s731_s28 = scalar_lea.vmem %s204_s29, 32  ;;  %s867_s11 = smov [#allocation5]  }
  0x43   : > { %p732_p2 = scmp.ne.s32.totalorder %s204_s29, %s731_s28  ;;  %s736_s19 = sshll.u32 %s867_s11, 4  ;;  %s737_s19 = int_to_ptr.vmem [resolvable:$false] %s736_s19 }
  0x44   : > { %s738_s21 = scalar_lea.vmem %s737_s19, 64  ;;  %p739_p8 = scmp.lt.s32.totalorder %s204_s29, %s737_s19 }
  0x45   : > { %p734_p9 = pnand %p732_p2, %p688_p5  ;;  %p740_p7 = scmp.lt.s32.totalorder %s738_s21, %s731_s28 }
  0x47   : > { %p735_p11 = pneg %p734_p9  ;;  %p741_p3 = por %p740_p7, %p739_p8 }
  0x49   : > { %p742_p6 = pnand %p741_p3, %p735_p11 }
  0x4b   : > { %745 = shalt.err (!%p742_p6)
}
  0x4c   : > { %616 = dma.hbm_to_vmem [thread:$0]  (!%p969_p0), %s1014_s22, 32, %s204_s29, %s190_s6  }
  0x4d   : > { %p1184_p13 = scmp.ne.s32.totalorder %s1183_s7, 0 }
  0x4e   : > { %s1039_s23 = sand.u32 (!%p1184_p13), 1, %s848_s13   ;;  %p1185_p5 = scmp.ne.s32.totalorder (!%p1184_p13), %s1177_s24, 0 }
  0x4f   : > { %212 = sbr.rel (%p1184_p13) target bundleno = 200 (0xc8), region = 28  ;;  %s586_s8 = sshll.u32 (!%p1184_p13), %s1039_s23, 3 }
  0x50   : > { %s215_s10 = scalar_lea.sflag (!%p1184_p13), [#allocation3], %s1039_s23  ;;  %s218_s30 = scalar_lea.vmem (!%p1184_p13), [#allocation2], %s586_s8 }
  0x56   : > { %827 = dma.done.wait (%p1185_p5), %s215_s10, 128  }
  0x57   : > { %829 = vsyncadd (%p1185_p5), %s215_s10, 4294967168  ;;  %s1048_s9 = sshll.u32 %s1039_s23, 1  ;;  %s224_s7 = scalar_lea.sflag [#allocation6], %s1039_s23 }
  0x58   : > { %s227_s22 = scalar_lea.vmem [#allocation5], %s1048_s9 }
  0x59   : > { %831 = dma.done.wait (%p1185_p5), %s224_s7, 32  }
  0x5a   : > { %833 = vsyncadd (%p1185_p5), %s224_s7, 4294967264  ;;  %vm273_vm0 = vcmask 1043456   ;;  %v266_v0 = vld [vmem:[%s218_s30] sm:$0xff]  ;;  %v318_v15 = vlaneseq  ;;  %v1058_v17 = vld [vmem:[%s227_s22] sm:$0x3]  ;;  %s259_s24 = scalar_lea.vmem [#allocation8], %s1048_s9 }
  0x5b   : > { %v271_v1 = vcombine.high %v266_v0, %v266_v0  ;;  %v274_v2 = vsel %vm273_vm0, %v266_v0, -inf  ;;  %vm268_vm1 = vcmp.ne.s32.totalorder %v1058_v17, 255  ;;  %v868_v57 = vmov 1966171168   ;;  %s434_s29 = sshll.u32 %s259_s24, 4  ;;  %s600_s6 = sshll.u32 %s856_s15, 5  ;;  %s1076_s29 = int_to_ptr.vmem [resolvable:$true] %s434_s29 }
  0x5c   : > { %v275_v3 = vrot.slane %v274_v2, 4  ;;  %v319_v19 = vshrl.u32 %v318_v15, 7  ;;  %v269_v23 = vsel %vm268_vm1, %v1058_v17, 0  ;;  %v358_v58 = vunpack.c.l.s4 %v868_v57  ;;  %s1083_s18 = scalar_lea.hbm %s1173_s3, %s600_s6  ;;  %s404_s28 = scalar_lea.sflag [#allocation9], %s1039_s23 }
  0x5d   : > { %v281_v4 = vsel %vm273_vm0, %v271_v1, -inf  ;;  %vm1072_vm4 = vcmp.lt.s32.totalorder %v318_v15, 256  ;;  %s746_s11 = scalar_lea.vmem %s1076_s29, 32  ;;  %p1188_p0 = scmp.ne.s32.totalorder %s1178_s25, 0 }
  0x5e   : > { %v276_v5 = vmax.f32 %v274_v2, %v275_v3  ;;  %v282_v6 = vrot.slane %v281_v4, 4  ;;  %v322_v22 = vsub.s32 0, %v319_v19  ;;  %v326_v24 = vsub.s32 1, %v319_v19  ;;  %p747_p8 = scmp.ne.s32.totalorder %s1076_s29, %s746_s11  ;;  %s869_s19 = smov [#allocation8]  }
  0x5f   : > { %v359_v2 = vunpack.c.0.s8 %v358_v58  ;;  %s750_s21 = sshll.u32 %s869_s19, 4  ;;  %s751_s21 = int_to_ptr.vmem [resolvable:$false] %s750_s21 }
  0x60   : > { %v277_v7 = vrot.slane %v276_v5, 2  ;;  %v283_v8 = vmax.f32 %v281_v4, %v282_v6  ;;  %v323_v25 = vrot.slane %v269_v23, %v322_v22  ;;  %v327_v26 = vrot.slane %v269_v23, %v326_v24  ;;  %p748_p7 = pnand %p747_p8, %p1188_p0  ;;  %s752_s8 = scalar_lea.vmem %s751_s21, 64 }
  0x61   : > { %p753_p10 = scmp.lt.s32.totalorder %s1076_s29, %s751_s21  ;;  %p754_p12 = scmp.lt.s32.totalorder %s752_s8, %s746_s11 }
  0x62   : > { %v278_v9 = vmax.f32 %v276_v5, %v277_v7  ;;  %v284_v10 = vrot.slane %v283_v8, 2  ;;  %vm328_vm2 = vcmp.eq.s32.totalorder %v319_v19, %v323_v25  ;;  %vm329_vm3 = vcmp.eq.s32.totalorder %v319_v19, %v327_v26  ;;  %p749_p4 = pneg %p748_p7 }
  0x63   : > { %v330_v27 = vsel %vm328_vm2, %v266_v0, 0.0  ;;  %v331_v31 = vsel %vm329_vm3, %v271_v1, 0.0  ;;  %v362_v7 = vsub.s32 %v359_v2, %v319_v19  ;;  %p755_p1 = por %p754_p12, %p753_p10 }
  0x64   : > { %v279_v11 = vrot.slane %v278_v9, 1  ;;  %v285_v12 = vmax.f32 %v283_v8, %v284_v10  ;;  %v332_v33 = vsel %vm273_vm0, %v330_v27, 0.0  ;;  %v339_v37 = vsel %vm273_vm0, %v331_v31, 0.0 }
  0x65   : > { %v333_v38 = vrot.slane %v332_v33, 4  ;;  %v340_v41 = vrot.slane %v339_v37, 4  ;;  %p756_p2 = pnand %p755_p1, %p749_p4 }
  0x66   : > { %v280_v13 = vmax.f32 %v278_v9, %v279_v11  ;;  %v286_v14 = vrot.slane %v285_v12, 1 }
  0x67   : > { %v334_v44 = vadd.f32 %v333_v38, %v332_v33  ;;  %v341_v47 = vadd.f32 %v340_v41, %v339_v37 }
  0x68   : > { %v287_v16 = vmax.f32 %v285_v12, %v286_v14 }
  0x69   : > { %v335_v50 = vrot.slane %v334_v44, 2  ;;  %v342_v52 = vrot.slane %v341_v47, 2 }
  0x6a   : > { %v290_v18 = vcombine.low %v280_v13, %v287_v16 }
  0x6b   : > { %v336_v53 = vadd.f32 %v335_v50, %v334_v44  ;;  %v343_v54 = vadd.f32 %v342_v52, %v341_v47 }
  0x6c   : > { %v292_v20 = vsub.f32 %v266_v0, %v290_v18 }
  0x6d   : > { %v337_v55 = vrot.slane %v336_v53, 1  ;;  %v344_v56 = vrot.slane %v343_v54, 1 }
  0x6e   : > { %v293_v21 = vmul.f32 1.442695, %v292_v20 }
  0x6f   : > { %v338_v61 = vadd.f32 %v337_v55, %v336_v53  ;;  %v345_v1 = vadd.f32 %v344_v56, %v343_v54 }
  0x70   : > { %676 = vpow2.f32 %v293_v21 }
  0x7a   : > { %v677_v28 = vpop.eup %676 }
  0x7b   : > { %v296_v29 = vcombine.high %v677_v28, %v677_v28  ;;  %v298_v30 = vsel %vm273_vm0, %v677_v28, 0.0 }
  0x7c   : > { %v299_v32 = vrot.slane %v298_v30, 4 }
  0x7d   : > { %v305_v34 = vsel %vm273_vm0, %v296_v29, 0.0 }
  0x7e   : > { %v300_v35 = vadd.f32 %v299_v32, %v298_v30  ;;  %v306_v36 = vrot.slane %v305_v34, 4 }
  0x80   : > { %v301_v39 = vrot.slane %v300_v35, 2  ;;  %v307_v40 = vadd.f32 %v306_v36, %v305_v34 }
  0x82   : > { %v302_v42 = vadd.f32 %v301_v39, %v300_v35  ;;  %v308_v43 = vrot.slane %v307_v40, 2 }
  0x84   : > { %v303_v45 = vrot.slane %v302_v42, 1  ;;  %v309_v46 = vadd.f32 %v308_v43, %v307_v40 }
  0x86   : > { %v304_v48 = vadd.f32 %v303_v45, %v302_v42  ;;  %v310_v49 = vrot.slane %v309_v46, 1 }
  0x88   : > { %v311_v51 = vadd.f32 %v310_v49, %v309_v46  ;;  %678 = vlog2.f32 %v304_v48 }
  0x8a   : > { %680 = vlog2.f32 %v311_v51 }
  0x92   : > { %v679_v59 = vpop.eup %678 }
  0x93   : > { %v313_v60 = vmul.f32 0.6931472, %v679_v59 }
  0x94   : > { %v681_v62 = vpop.eup %680 }
  0x95   : > { %v315_v63 = vmul.f32 0.6931472, %v681_v62  ;;  %v316_v0 = vadd.f32 %v313_v60, %v280_v13 }
  0x97   : > { %v317_v3 = vadd.f32 %v315_v63, %v287_v16  ;;  %v346_v4 = vsub.f32 %v316_v0, %v338_v61 }
  0x99   : > { %v347_v5 = vsub.f32 %v317_v3, %v345_v1  ;;  %v348_v6 = vsub.f32 0.0, %v346_v4 }
  0x9b   : > { %v349_v8 = vsub.f32 0.0, %v347_v5  ;;  %v350_v9 = vmul.f32 1.442695, %v348_v6  ;;  %v380_v10 = vcombine.low %v346_v4, %v347_v5 }
  0x9d   : > { %682 = vpow2.f32 %v350_v9  ;;  %v352_v11 = vmul.f32 1.442695, %v349_v8  ;;  %v387_v12 = vrot.slane %v380_v10, %v362_v7 }
  0x9f   : > { %684 = vpow2.f32 %v352_v11  ;;  %v394_v14 = vrot.slane %v387_v12, %v362_v7 }
  0xa1   : > { %v396_v16 = vsel %vm268_vm1, %v394_v14, 0.0 }
  0xa2   : > { %397 = vst.msk [vmem:[%s259_s24] sm:$0x3] %vm1072_vm4, %v396_v16 }
  0xa3   : > { %759 = shalt.err (!%p756_p2)
}
  0xa4   : > { %s760_s10 = scalar_lea.hbm %s1083_s18, 32  ;;  %s764_s22 = scalar_lea.hbm %s1173_s3, 64 }
  0xa5   : > { %p761_p9 = scmp.ne.s32.totalorder %s1083_s18, %s760_s10  ;;  %p765_p6 = scmp.lt.u32.totalorder %s1083_s18, %s1173_s3 }
  0xa6   : > { %p766_p13 = scmp.lt.u32.totalorder %s764_s22, %s760_s10  ;;  %p768_p8 = scmp.lt.u32.totalorder %s760_s10, %s1083_s18 }
  0xa7   : > { %p762_p11 = pnand %p761_p9, %p1188_p0 }
  0xa8   : > { %p767_p5 = por %p766_p13, %p765_p6 }
  0xa9   : > { %p763_p3 = pneg %p762_p11 }
  0xaa   : > { %p769_p7 = por %p768_p8, %p767_p5 }
  0xac   : > { %p770_p4 = pnand %p769_p7, %p763_p3 }
  0xae   : > { %773 = shalt.err (!%p770_p4)
}
  0xaf   : > { %607 = dma.vmem_to_hbm [thread:$0]  (%p1188_p0), %s1076_s29, 32, %s1083_s18, %s404_s28   ;;  %v683_v15 = vpop.eup %682 }
  0xb0   : > { %v685_v18 = vpop.eup %684  ;;  %s252_s5 = scalar_lea.vmem [#allocation7], %s1048_s9  ;;  %s1119_s8 = scalar_lea.hbm %s1172_s2, %s600_s6 }
  0xb1   : > { %v356_v19 = vcombine.low %v683_v15, %v685_v18  ;;  %s419_s11 = sshll.u32 %s252_s5, 4  ;;  %s399_s9 = scalar_lea.sflag [#allocation4], %s1039_s23  ;;  %s1112_s11 = int_to_ptr.vmem [resolvable:$true] %s419_s11 }
  0xb2   : > { %s774_s29 = scalar_lea.vmem %s1112_s11, 32  ;;  %s870_s15 = smov [#allocation7]  }
  0xb3   : > { %v363_v20 = vrot.slane %v356_v19, %v362_v7  ;;  %p775_p10 = scmp.ne.s32.totalorder %s1112_s11, %s774_s29  ;;  %s778_s18 = sshll.u32 %s870_s15, 4  ;;  %s779_s18 = int_to_ptr.vmem [resolvable:$false] %s778_s18 }
  0xb4   : > { %s780_s28 = scalar_lea.vmem %s779_s18, 64  ;;  %p781_p2 = scmp.lt.s32.totalorder %s1112_s11, %s779_s18 }
  0xb5   : > { %v370_v21 = vrot.slane %v363_v20, %v362_v7  ;;  %p776_p12 = pnand %p775_p10, %p1188_p0  ;;  %p782_p9 = scmp.lt.s32.totalorder %s780_s28, %s774_s29 }
  0xb7   : > { %v372_v22 = vsel %vm268_vm1, %v370_v21, 2.0  ;;  %p777_p1 = pneg %p776_p12  ;;  %p783_p11 = por %p782_p9, %p781_p2 }
  0xb8   : > { %377 = vst.msk [vmem:[%s252_s5] sm:$0x3] %vm1072_vm4, %v372_v22 }
  0xb9   : > { %p784_p3 = pnand %p783_p11, %p777_p1 }
  0xbb   : > { %787 = shalt.err (!%p784_p3)
}
  0xbc   : > { %s788_s23 = scalar_lea.hbm %s1119_s8, 32  ;;  %s792_s30 = scalar_lea.hbm %s1172_s2, 64 }
  0xbd   : > { %p789_p6 = scmp.ne.s32.totalorder %s1119_s8, %s788_s23  ;;  %p793_p8 = scmp.lt.u32.totalorder %s1119_s8, %s1172_s2 }
  0xbe   : > { %p794_p7 = scmp.lt.u32.totalorder %s792_s30, %s788_s23  ;;  %p796_p10 = scmp.lt.u32.totalorder %s788_s23, %s1119_s8 }
  0xbf   : > { %p790_p13 = pnand %p789_p6, %p1188_p0 }
  0xc0   : > { %p795_p4 = por %p794_p7, %p793_p8 }
  0xc1   : > { %p791_p5 = pneg %p790_p13 }
  0xc2   : > { %p797_p12 = por %p796_p10, %p795_p4 }
  0xc4   : > { %p798_p1 = pnand %p797_p12, %p791_p5 }
  0xc6   : > { %801 = shalt.err (!%p798_p1)
}
  0xc7   : > { %606 = dma.vmem_to_hbm [thread:$0]  (%p1188_p0), %s1112_s11, 32, %s1119_s8, %s399_s9  }
  0xc8 PF: > { %s446_s24 = sand.u32 1, %s844_s12   ;;  %p1189_p2 = scmp.ne.s32.totalorder %s1179_s27, 0 }
  0xc9   : > { %p1190_p9 = scmp.ge.s32.totalorder %s864_s17, 2  ;;  %s447_s4 = scalar_lea.sflag [#allocation4], %s446_s24 }
  0xcb   : > { %p618_p11 = pnand %p1190_p9, %p1189_p2 }
  0xcd   : > { %835 = dma.done.wait (!%p618_p11), %s447_s4, 32  }
  0xce   : > { %837 = vsyncadd (!%p618_p11), %s447_s4, 4294967264  ;;  %s456_s5 = scalar_lea.sflag [#allocation9], %s446_s24 }
  0xcf   : > { %839 = dma.done.wait (!%p618_p11), %s456_s5, 32  }
  0xd0   : > { %841 = vsyncadd (!%p618_p11), %s456_s5, 4294967264  ;;  %s26_s17 = sadd.s32 1, %s864_s17   ;;  %s1191_s12 = smov %s848_s13 }
  0xd1   : > { %p23_p3 = scmp.ge.s32.totalorder %s26_s17, 4   ;;  %s1192_s13 = smov %s852_s14 }
  0xd2   : > { %s1193_s14 = smov %s947_s26  ;;  %s1194_s15 = smov %s860_s16 }
  0xd3   : > { %s1195_s16 = smov %s1197_s20  ;;  %25 = sbr.rel (!%p23_p3) target bundleno = 10 (0xa), region = 103 }
  0xda   :  { %461 = vsyncpa [#allocation3], 1 }
  0xdb   :  { %463 = vsyncpa [#allocation3 + $0x1], 1 }
  0xdc   :  { %464 = vsyncpa [#allocation6], 1 }
  0xdd   :  { %466 = vsyncpa [#allocation6 + $0x1], 1 }
  0xde   :  { %467 = vsyncpa [#allocation4], 1 }
  0xdf   :  { %469 = vsyncpa [#allocation4 + $0x1], 1 }
  0xe0   :  { %470 = vsyncpa [#allocation9], 1 }
  0xe1   :  { %472 = vsyncpa [#allocation9 + $0x1], 1 }

</bundles_post_ra>
